<compile_context>
chip_gen: v7x
topology: tpu7x:2x2x1
jax: 0.10.0
libtpu: 0.0.40
codegen_flags: <defaults>
</compile_context>

<pallas_src>
import functools

import jax
import jax.numpy as jnp
from jax import lax
from jax.experimental import pallas as pl
from jax.experimental.pallas import tpu as pltpu


def _round_up(x, m):
    return (x + m - 1) // m * m


# ----------------------------- Pallas kernel ------------------------------ #
def _decoder_kernel(emb_ref, w_ih_ref, w_hh_ref, bias_ref, w_out_ref,
                    b_out_ref, out_ref, hs_sc, *, batch, seq_len):
    """Whole DecoderRNN forward in a single (grid-less) kernel invocation.

    emb_ref  : (T*Bp, E)  time-major embeddings (row = t*Bp + b), B padded
    w_ih_ref : (E, 4H)    input->gates weights (pre-transposed)
    w_hh_ref : (H, 4H)    hidden->gates weights (pre-transposed)
    bias_ref : (1, 4H)    b_ih + b_hh
    w_out_ref: (H, Vp)    output projection, V padded to a lane multiple
    b_out_ref: (1, Vp)
    out_ref  : (T*Bp, Vp) logits (row = t*Bp + b)
    hs_sc    : (T*Bp, H)  VMEM scratch collecting hidden states
    """
    Bp = batch
    T = seq_len
    H = w_hh_ref.shape[0]

    # ---- Hoisted input projection: one MXU pass for all T time steps. ----
    xw = jnp.dot(emb_ref[...], w_ih_ref[...],
                 preferred_element_type=jnp.float32) + bias_ref[...]
    w_hh = w_hh_ref[...]

    # ---- Serial recurrence over time (fully unrolled, T small & static). ----
    h = jnp.zeros((Bp, H), jnp.float32)
    c = jnp.zeros((Bp, H), jnp.float32)
    for t in range(T):
        gates = xw[t * Bp:(t + 1) * Bp, :] + jnp.dot(
            h, w_hh, preferred_element_type=jnp.float32)
        # PyTorch LSTM gate ordering: i, f, g, o
        i_g = jax.nn.sigmoid(gates[:, 0 * H:1 * H])
        f_g = jax.nn.sigmoid(gates[:, 1 * H:2 * H])
        g_g = jnp.tanh(gates[:, 2 * H:3 * H])
        o_g = jax.nn.sigmoid(gates[:, 3 * H:4 * H])
        c = f_g * c + i_g * g_g
        h = o_g * jnp.tanh(c)
        hs_sc[t * Bp:(t + 1) * Bp, :] = h

    # ---- Hoisted vocab projection: single (T*Bp, H) x (H, Vp) matmul. ----
    logits = jnp.dot(hs_sc[...], w_out_ref[...],
                     preferred_element_type=jnp.float32) + b_out_ref[...]
    out_ref[...] = logits.astype(out_ref.dtype)


def _decoder_pallas(emb2d, w_ih_t, w_hh_t, bias, w_out_p, b_out_p, Bp, T):
    TB, _ = emb2d.shape
    H = w_hh_t.shape[0]
    Vp = w_out_p.shape[1]
    kernel = functools.partial(_decoder_kernel, batch=Bp, seq_len=T)
    vmem = pltpu.MemorySpace.VMEM
    return pl.pallas_call(
        kernel,
        out_shape=jax.ShapeDtypeStruct((TB, Vp), jnp.float32),
        in_specs=[pl.BlockSpec(memory_space=vmem)] * 6,
        out_specs=pl.BlockSpec(memory_space=vmem),
        scratch_shapes=[pltpu.VMEM((TB, H), jnp.float32)],
    )(emb2d, w_ih_t, w_hh_t, bias, w_out_p, b_out_p)


# ------------------------------ Module glue ------------------------------- #
def decoder_rnn_forward(params, features, captions):
    """Replicates DecoderRNN.forward.

    features: (B, E) float32
    captions: (B, T_cap) int32
    returns : (B, T_cap, V) float32   (T = 1 + (T_cap - 1) time steps)
    """
    B, Tcap = captions.shape
    T = Tcap
    V = params["w_out_t"].shape[1]

    # Embedding lookup + feature prepend, built directly time-major so the
    # kernel's internal row ordering needs no in-kernel relayout.
    cap_ids_tm = jnp.transpose(captions[:, :-1])                 # (T-1, B)
    cap_emb_tm = jnp.take(params["embed"], cap_ids_tm, axis=0)   # (T-1, B, E)
    emb_tm = jnp.concatenate([features[None, :, :], cap_emb_tm], axis=0)

    Bp = _round_up(B, 8)      # sublane multiple
    Vp = _round_up(V, 128)    # lane-dense output width

    emb_tm = jnp.pad(emb_tm, ((0, 0), (0, Bp - B), (0, 0)))      # (T, Bp, E)
    emb2d = emb_tm.reshape(T * Bp, emb_tm.shape[-1])             # (T*Bp, E)

    w_out_p = jnp.pad(params["w_out_t"], ((0, 0), (0, Vp - V)))
    b_out_p = jnp.pad(params["b_out"], ((0, 0), (0, Vp - V)))

    logits2d = _decoder_pallas(emb2d, params["w_ih_t"], params["w_hh_t"],
                               params["bias"], w_out_p, b_out_p, Bp, T)
    logits = logits2d.reshape(T, Bp, Vp)[:, :B, :V]
    return jnp.transpose(logits, (1, 0, 2))                      # (B, T, V)


# --------------------------- Pure-JAX reference ---------------------------- #
def decoder_rnn_reference(params, features, captions):
    cap_emb = jnp.take(params["embed"], captions[:, :-1], axis=0)
    emb = jnp.concatenate([features[:, None, :], cap_emb], axis=1)  # (B, T, E)
    B = emb.shape[0]
    H = params["w_hh_t"].shape[0]

    def step(carry, x_t):
        h, c = carry
        gates = x_t @ params["w_ih_t"] + h @ params["w_hh_t"] + params["bias"]
        i_g = jax.nn.sigmoid(gates[:, 0 * H:1 * H])
        f_g = jax.nn.sigmoid(gates[:, 1 * H:2 * H])
        g_g = jnp.tanh(gates[:, 2 * H:3 * H])
        o_g = jax.nn.sigmoid(gates[:, 3 * H:4 * H])
        c_new = f_g * c + i_g * g_g
        h_new = o_g * jnp.tanh(c_new)
        return (h_new, c_new), h_new

    h0 = jnp.zeros((B, H), jnp.float32)
    c0 = jnp.zeros((B, H), jnp.float32)
    _, hs = lax.scan(step, (h0, c0), jnp.transpose(emb, (1, 0, 2)))
    logits = hs @ params["w_out_t"] + params["b_out"]  # (T, B, V)
    return jnp.transpose(logits, (1, 0, 2))


# --------------------------------- main ------------------------------------ #
if __name__ == "__main__":
    embed_size = 32
    hidden_size = 32
    vocab_size = 64
    batch = 2
    cap_len = 8  # captions length; LSTM runs 1 + (cap_len - 1) = 8 steps

    key = jax.random.PRNGKey(0)
    ks = jax.random.split(key, 9)

    params = {
        # nn.Embedding(vocab_size, embed_size)
        "embed": jax.random.normal(ks[0], (vocab_size, embed_size),
                                   jnp.float32) * 0.1,
        # nn.LSTM weights, pre-transposed: W_ih (4H,E) -> (E,4H), etc.
        "w_ih_t": jax.random.normal(ks[1], (embed_size, 4 * hidden_size),
                                    jnp.float32) * 0.1,
        "w_hh_t": jax.random.normal(ks[2], (hidden_size, 4 * hidden_size),
                                    jnp.float32) * 0.1,
        "bias": (jax.random.normal(ks[3], (1, 4 * hidden_size), jnp.float32)
                 * 0.1
                 + jax.random.normal(ks[4], (1, 4 * hidden_size), jnp.float32)
                 * 0.1),  # b_ih + b_hh
        # nn.Linear(hidden_size, vocab_size), pre-transposed
        "w_out_t": jax.random.normal(ks[5], (hidden_size, vocab_size),
                                     jnp.float32) * 0.1,
        "b_out": jax.random.normal(ks[6], (1, vocab_size), jnp.float32) * 0.1,
    }

    features = jax.random.normal(ks[7], (batch, embed_size), jnp.float32)
    captions = jax.random.randint(ks[8], (batch, cap_len), 0, vocab_size,
                                  jnp.int32)

    out = jax.jit(decoder_rnn_forward)(params, features, captions)
    out = jax.block_until_ready(out)

    ref = decoder_rnn_reference(params, features, captions)
    assert out.shape == (batch, cap_len, vocab_size), out.shape
    assert jnp.allclose(out, ref, atol=1e-4, rtol=1e-4), (
        float(jnp.max(jnp.abs(out - ref))))

    # TODO(synk): `sample()` greedy decoding (host-side argmax / early stop)
    # is inference control flow, not a kernel hot path; not implemented here.
    print("KERNEL_OK")
</pallas_src>

<mosaic_0001>
module attributes {stable_mosaic.version = 11 : i64} {
  func.func @_decoder_kernel(%arg0: memref<64x32xf32, #tpu.memory_space<vmem>>, %arg1: memref<32x128xf32, #tpu.memory_space<vmem>>, %arg2: memref<32x128xf32, #tpu.memory_space<vmem>>, %arg3: memref<1x128xf32, #tpu.memory_space<vmem>>, %arg4: memref<32x128xf32, #tpu.memory_space<vmem>>, %arg5: memref<1x128xf32, #tpu.memory_space<vmem>>, %arg6: memref<64x128xf32, #tpu.memory_space<vmem>>, %arg7: memref<64x32xf32, #tpu.memory_space<vmem>>) attributes {dimension_semantics = [], scalar_prefetch = 0 : i64, scratch_operands = 1 : i64, tpu.core_type = #tpu.core_type<tc>} {
    %c0 = arith.constant 0 : index
    %c0_0 = arith.constant 0 : index
    %0 = vector.load %arg0[%c0, %c0_0] : memref<64x32xf32, #tpu.memory_space<vmem>>, vector<64x32xf32>
    %c0_1 = arith.constant 0 : index
    %c0_2 = arith.constant 0 : index
    %1 = vector.load %arg1[%c0_1, %c0_2] : memref<32x128xf32, #tpu.memory_space<vmem>>, vector<32x128xf32>
    %cst = arith.constant dense<0.000000e+00> : vector<64x128xf32>
    %2 = tpu.matmul %0, %1, %cst {dimension_numbers = #tpu.dot_dimension_numbers<[1], [0], [0], [1], [0, 0, 1, 1], [], []>} : vector<64x32xf32>, vector<32x128xf32>, vector<64x128xf32> -> vector<64x128xf32>
    %c0_3 = arith.constant 0 : index
    %c0_4 = arith.constant 0 : index
    %3 = vector.load %arg3[%c0_3, %c0_4] : memref<1x128xf32, #tpu.memory_space<vmem>>, vector<1x128xf32>
    %4 = vector.broadcast %3 : vector<1x128xf32> to vector<64x128xf32>
    %5 = arith.addf %2, %4 : vector<64x128xf32>
    %c0_5 = arith.constant 0 : index
    %c0_6 = arith.constant 0 : index
    %6 = vector.load %arg2[%c0_5, %c0_6] : memref<32x128xf32, #tpu.memory_space<vmem>>, vector<32x128xf32>
    %cst_7 = arith.constant 0.000000e+00 : f32
    %7 = vector.broadcast %cst_7 : f32 to vector<8x32xf32>
    %cst_8 = arith.constant 0.000000e+00 : f32
    %8 = vector.broadcast %cst_8 : f32 to vector<8x32xf32>
    %9 = vector.extract_strided_slice %5 {offsets = [0, 0], sizes = [8, 128], strides = [1, 1]} : vector<64x128xf32> to vector<8x128xf32>
    %cst_9 = arith.constant dense<0.000000e+00> : vector<8x128xf32>
    %10 = tpu.matmul %7, %6, %cst_9 {dimension_numbers = #tpu.dot_dimension_numbers<[1], [0], [0], [1], [0, 0, 1, 1], [], []>} : vector<8x32xf32>, vector<32x128xf32>, vector<8x128xf32> -> vector<8x128xf32>
    %11 = arith.addf %9, %10 : vector<8x128xf32>
    %12 = vector.extract_strided_slice %11 {offsets = [0, 0], sizes = [8, 32], strides = [1, 1]} : vector<8x128xf32> to vector<8x32xf32>
    %13 = arith.negf %12 : vector<8x32xf32>
    %14 = math.exp %13 : vector<8x32xf32>
    %cst_10 = arith.constant 1.000000e+00 : f32
    %15 = vector.broadcast %cst_10 : f32 to vector<8x32xf32>
    %16 = arith.addf %15, %14 : vector<8x32xf32>
    %17 = arith.divf %15, %16 : vector<8x32xf32>
    %18 = vector.extract_strided_slice %11 {offsets = [0, 32], sizes = [8, 32], strides = [1, 1]} : vector<8x128xf32> to vector<8x32xf32>
    %19 = arith.negf %18 : vector<8x32xf32>
    %20 = math.exp %19 : vector<8x32xf32>
    %cst_11 = arith.constant 1.000000e+00 : f32
    %21 = vector.broadcast %cst_11 : f32 to vector<8x32xf32>
    %22 = arith.addf %21, %20 : vector<8x32xf32>
    %23 = arith.divf %21, %22 : vector<8x32xf32>
    %24 = vector.extract_strided_slice %11 {offsets = [0, 64], sizes = [8, 32], strides = [1, 1]} : vector<8x128xf32> to vector<8x32xf32>
    %25 = math.tanh %24 : vector<8x32xf32>
    %26 = vector.extract_strided_slice %11 {offsets = [0, 96], sizes = [8, 32], strides = [1, 1]} : vector<8x128xf32> to vector<8x32xf32>
    %27 = arith.negf %26 : vector<8x32xf32>
    %28 = math.exp %27 : vector<8x32xf32>
    %cst_12 = arith.constant 1.000000e+00 : f32
    %29 = vector.broadcast %cst_12 : f32 to vector<8x32xf32>
    %30 = arith.addf %29, %28 : vector<8x32xf32>
    %31 = arith.divf %29, %30 : vector<8x32xf32>
    %32 = arith.mulf %23, %8 : vector<8x32xf32>
    %33 = arith.mulf %17, %25 : vector<8x32xf32>
    %34 = arith.addf %32, %33 : vector<8x32xf32>
    %35 = math.tanh %34 : vector<8x32xf32>
    %36 = arith.mulf %31, %35 : vector<8x32xf32>
    %c0_13 = arith.constant 0 : index
    %c0_14 = arith.constant 0 : index
    %37 = vector.load %arg7[%c0_13, %c0_14] : memref<64x32xf32, #tpu.memory_space<vmem>>, vector<8x32xf32>
    tpu.vector_store %arg7[%c0_13, %c0_14], %36 {strides = array<i32>} : memref<64x32xf32, #tpu.memory_space<vmem>>, vector<8x32xf32>,
    %38 = vector.extract_strided_slice %5 {offsets = [8, 0], sizes = [8, 128], strides = [1, 1]} : vector<64x128xf32> to vector<8x128xf32>
    %cst_15 = arith.constant dense<0.000000e+00> : vector<8x128xf32>
    %39 = tpu.matmul %36, %6, %cst_15 {dimension_numbers = #tpu.dot_dimension_numbers<[1], [0], [0], [1], [0, 0, 1, 1], [], []>} : vector<8x32xf32>, vector<32x128xf32>, vector<8x128xf32> -> vector<8x128xf32>
    %40 = arith.addf %38, %39 : vector<8x128xf32>
    %41 = vector.extract_strided_slice %40 {offsets = [0, 0], sizes = [8, 32], strides = [1, 1]} : vector<8x128xf32> to vector<8x32xf32>
    %42 = arith.negf %41 : vector<8x32xf32>
    %43 = math.exp %42 : vector<8x32xf32>
    %cst_16 = arith.constant 1.000000e+00 : f32
    %44 = vector.broadcast %cst_16 : f32 to vector<8x32xf32>
    %45 = arith.addf %44, %43 : vector<8x32xf32>
    %46 = arith.divf %44, %45 : vector<8x32xf32>
    %47 = vector.extract_strided_slice %40 {offsets = [0, 32], sizes = [8, 32], strides = [1, 1]} : vector<8x128xf32> to vector<8x32xf32>
    %48 = arith.negf %47 : vector<8x32xf32>
    %49 = math.exp %48 : vector<8x32xf32>
    %cst_17 = arith.constant 1.000000e+00 : f32
    %50 = vector.broadcast %cst_17 : f32 to vector<8x32xf32>
    %51 = arith.addf %50, %49 : vector<8x32xf32>
    %52 = arith.divf %50, %51 : vector<8x32xf32>
    %53 = vector.extract_strided_slice %40 {offsets = [0, 64], sizes = [8, 32], strides = [1, 1]} : vector<8x128xf32> to vector<8x32xf32>
    %54 = math.tanh %53 : vector<8x32xf32>
    %55 = vector.extract_strided_slice %40 {offsets = [0, 96], sizes = [8, 32], strides = [1, 1]} : vector<8x128xf32> to vector<8x32xf32>
    %56 = arith.negf %55 : vector<8x32xf32>
    %57 = math.exp %56 : vector<8x32xf32>
    %cst_18 = arith.constant 1.000000e+00 : f32
    %58 = vector.broadcast %cst_18 : f32 to vector<8x32xf32>
    %59 = arith.addf %58, %57 : vector<8x32xf32>
    %60 = arith.divf %58, %59 : vector<8x32xf32>
    %61 = arith.mulf %52, %34 : vector<8x32xf32>
    %62 = arith.mulf %46, %54 : vector<8x32xf32>
    %63 = arith.addf %61, %62 : vector<8x32xf32>
    %64 = math.tanh %63 : vector<8x32xf32>
    %65 = arith.mulf %60, %64 : vector<8x32xf32>
    %c8 = arith.constant 8 : index
    %c0_19 = arith.constant 0 : index
    %66 = vector.load %arg7[%c8, %c0_19] : memref<64x32xf32, #tpu.memory_space<vmem>>, vector<8x32xf32>
    tpu.vector_store %arg7[%c8, %c0_19], %65 {strides = array<i32>} : memref<64x32xf32, #tpu.memory_space<vmem>>, vector<8x32xf32>,
    %67 = vector.extract_strided_slice %5 {offsets = [16, 0], sizes = [8, 128], strides = [1, 1]} : vector<64x128xf32> to vector<8x128xf32>
    %cst_20 = arith.constant dense<0.000000e+00> : vector<8x128xf32>
    %68 = tpu.matmul %65, %6, %cst_20 {dimension_numbers = #tpu.dot_dimension_numbers<[1], [0], [0], [1], [0, 0, 1, 1], [], []>} : vector<8x32xf32>, vector<32x128xf32>, vector<8x128xf32> -> vector<8x128xf32>
    %69 = arith.addf %67, %68 : vector<8x128xf32>
    %70 = vector.extract_strided_slice %69 {offsets = [0, 0], sizes = [8, 32], strides = [1, 1]} : vector<8x128xf32> to vector<8x32xf32>
    %71 = arith.negf %70 : vector<8x32xf32>
    %72 = math.exp %71 : vector<8x32xf32>
    %cst_21 = arith.constant 1.000000e+00 : f32
    %73 = vector.broadcast %cst_21 : f32 to vector<8x32xf32>
    %74 = arith.addf %73, %72 : vector<8x32xf32>
    %75 = arith.divf %73, %74 : vector<8x32xf32>
    %76 = vector.extract_strided_slice %69 {offsets = [0, 32], sizes = [8, 32], strides = [1, 1]} : vector<8x128xf32> to vector<8x32xf32>
    %77 = arith.negf %76 : vector<8x32xf32>
    %78 = math.exp %77 : vector<8x32xf32>
    %cst_22 = arith.constant 1.000000e+00 : f32
    %79 = vector.broadcast %cst_22 : f32 to vector<8x32xf32>
    %80 = arith.addf %79, %78 : vector<8x32xf32>
    %81 = arith.divf %79, %80 : vector<8x32xf32>
    %82 = vector.extract_strided_slice %69 {offsets = [0, 64], sizes = [8, 32], strides = [1, 1]} : vector<8x128xf32> to vector<8x32xf32>
    %83 = math.tanh %82 : vector<8x32xf32>
    %84 = vector.extract_strided_slice %69 {offsets = [0, 96], sizes = [8, 32], strides = [1, 1]} : vector<8x128xf32> to vector<8x32xf32>
    %85 = arith.negf %84 : vector<8x32xf32>
    %86 = math.exp %85 : vector<8x32xf32>
    %cst_23 = arith.constant 1.000000e+00 : f32
    %87 = vector.broadcast %cst_23 : f32 to vector<8x32xf32>
    %88 = arith.addf %87, %86 : vector<8x32xf32>
    %89 = arith.divf %87, %88 : vector<8x32xf32>
    %90 = arith.mulf %81, %63 : vector<8x32xf32>
    %91 = arith.mulf %75, %83 : vector<8x32xf32>
    %92 = arith.addf %90, %91 : vector<8x32xf32>
    %93 = math.tanh %92 : vector<8x32xf32>
    %94 = arith.mulf %89, %93 : vector<8x32xf32>
    %c16 = arith.constant 16 : index
    %c0_24 = arith.constant 0 : index
    %95 = vector.load %arg7[%c16, %c0_24] : memref<64x32xf32, #tpu.memory_space<vmem>>, vector<8x32xf32>
    tpu.vector_store %arg7[%c16, %c0_24], %94 {strides = array<i32>} : memref<64x32xf32, #tpu.memory_space<vmem>>, vector<8x32xf32>,
    %96 = vector.extract_strided_slice %5 {offsets = [24, 0], sizes = [8, 128], strides = [1, 1]} : vector<64x128xf32> to vector<8x128xf32>
    %cst_25 = arith.constant dense<0.000000e+00> : vector<8x128xf32>
    %97 = tpu.matmul %94, %6, %cst_25 {dimension_numbers = #tpu.dot_dimension_numbers<[1], [0], [0], [1], [0, 0, 1, 1], [], []>} : vector<8x32xf32>, vector<32x128xf32>, vector<8x128xf32> -> vector<8x128xf32>
    %98 = arith.addf %96, %97 : vector<8x128xf32>
    %99 = vector.extract_strided_slice %98 {offsets = [0, 0], sizes = [8, 32], strides = [1, 1]} : vector<8x128xf32> to vector<8x32xf32>
    %100 = arith.negf %99 : vector<8x32xf32>
    %101 = math.exp %100 : vector<8x32xf32>
    %cst_26 = arith.constant 1.000000e+00 : f32
    %102 = vector.broadcast %cst_26 : f32 to vector<8x32xf32>
    %103 = arith.addf %102, %101 : vector<8x32xf32>
    %104 = arith.divf %102, %103 : vector<8x32xf32>
    %105 = vector.extract_strided_slice %98 {offsets = [0, 32], sizes = [8, 32], strides = [1, 1]} : vector<8x128xf32> to vector<8x32xf32>
    %106 = arith.negf %105 : vector<8x32xf32>
    %107 = math.exp %106 : vector<8x32xf32>
    %cst_27 = arith.constant 1.000000e+00 : f32
    %108 = vector.broadcast %cst_27 : f32 to vector<8x32xf32>
    %109 = arith.addf %108, %107 : vector<8x32xf32>
    %110 = arith.divf %108, %109 : vector<8x32xf32>
    %111 = vector.extract_strided_slice %98 {offsets = [0, 64], sizes = [8, 32], strides = [1, 1]} : vector<8x128xf32> to vector<8x32xf32>
    %112 = math.tanh %111 : vector<8x32xf32>
    %113 = vector.extract_strided_slice %98 {offsets = [0, 96], sizes = [8, 32], strides = [1, 1]} : vector<8x128xf32> to vector<8x32xf32>
    %114 = arith.negf %113 : vector<8x32xf32>
    %115 = math.exp %114 : vector<8x32xf32>
    %cst_28 = arith.constant 1.000000e+00 : f32
    %116 = vector.broadcast %cst_28 : f32 to vector<8x32xf32>
    %117 = arith.addf %116, %115 : vector<8x32xf32>
    %118 = arith.divf %116, %117 : vector<8x32xf32>
    %119 = arith.mulf %110, %92 : vector<8x32xf32>
    %120 = arith.mulf %104, %112 : vector<8x32xf32>
    %121 = arith.addf %119, %120 : vector<8x32xf32>
    %122 = math.tanh %121 : vector<8x32xf32>
    %123 = arith.mulf %118, %122 : vector<8x32xf32>
    %c24 = arith.constant 24 : index
    %c0_29 = arith.constant 0 : index
    %124 = vector.load %arg7[%c24, %c0_29] : memref<64x32xf32, #tpu.memory_space<vmem>>, vector<8x32xf32>
    tpu.vector_store %arg7[%c24, %c0_29], %123 {strides = array<i32>} : memref<64x32xf32, #tpu.memory_space<vmem>>, vector<8x32xf32>,
    %125 = vector.extract_strided_slice %5 {offsets = [32, 0], sizes = [8, 128], strides = [1, 1]} : vector<64x128xf32> to vector<8x128xf32>
    %cst_30 = arith.constant dense<0.000000e+00> : vector<8x128xf32>
    %126 = tpu.matmul %123, %6, %cst_30 {dimension_numbers = #tpu.dot_dimension_numbers<[1], [0], [0], [1], [0, 0, 1, 1], [], []>} : vector<8x32xf32>, vector<32x128xf32>, vector<8x128xf32> -> vector<8x128xf32>
    %127 = arith.addf %125, %126 : vector<8x128xf32>
    %128 = vector.extract_strided_slice %127 {offsets = [0, 0], sizes = [8, 32], strides = [1, 1]} : vector<8x128xf32> to vector<8x32xf32>
    %129 = arith.negf %128 : vector<8x32xf32>
    %130 = math.exp %129 : vector<8x32xf32>
    %cst_31 = arith.constant 1.000000e+00 : f32
    %131 = vector.broadcast %cst_31 : f32 to vector<8x32xf32>
    %132 = arith.addf %131, %130 : vector<8x32xf32>
    %133 = arith.divf %131, %132 : vector<8x32xf32>
    %134 = vector.extract_strided_slice %127 {offsets = [0, 32], sizes = [8, 32], strides = [1, 1]} : vector<8x128xf32> to vector<8x32xf32>
    %135 = arith.negf %134 : vector<8x32xf32>
    %136 = math.exp %135 : vector<8x32xf32>
    %cst_32 = arith.constant 1.000000e+00 : f32
    %137 = vector.broadcast %cst_32 : f32 to vector<8x32xf32>
    %138 = arith.addf %137, %136 : vector<8x32xf32>
    %139 = arith.divf %137, %138 : vector<8x32xf32>
    %140 = vector.extract_strided_slice %127 {offsets = [0, 64], sizes = [8, 32], strides = [1, 1]} : vector<8x128xf32> to vector<8x32xf32>
    %141 = math.tanh %140 : vector<8x32xf32>
    %142 = vector.extract_strided_slice %127 {offsets = [0, 96], sizes = [8, 32], strides = [1, 1]} : vector<8x128xf32> to vector<8x32xf32>
    %143 = arith.negf %142 : vector<8x32xf32>
    %144 = math.exp %143 : vector<8x32xf32>
    %cst_33 = arith.constant 1.000000e+00 : f32
    %145 = vector.broadcast %cst_33 : f32 to vector<8x32xf32>
    %146 = arith.addf %145, %144 : vector<8x32xf32>
    %147 = arith.divf %145, %146 : vector<8x32xf32>
    %148 = arith.mulf %139, %121 : vector<8x32xf32>
    %149 = arith.mulf %133, %141 : vector<8x32xf32>
    %150 = arith.addf %148, %149 : vector<8x32xf32>
    %151 = math.tanh %150 : vector<8x32xf32>
    %152 = arith.mulf %147, %151 : vector<8x32xf32>
    %c32 = arith.constant 32 : index
    %c0_34 = arith.constant 0 : index
    %153 = vector.load %arg7[%c32, %c0_34] : memref<64x32xf32, #tpu.memory_space<vmem>>, vector<8x32xf32>
    tpu.vector_store %arg7[%c32, %c0_34], %152 {strides = array<i32>} : memref<64x32xf32, #tpu.memory_space<vmem>>, vector<8x32xf32>,
    %154 = vector.extract_strided_slice %5 {offsets = [40, 0], sizes = [8, 128], strides = [1, 1]} : vector<64x128xf32> to vector<8x128xf32>
    %cst_35 = arith.constant dense<0.000000e+00> : vector<8x128xf32>
    %155 = tpu.matmul %152, %6, %cst_35 {dimension_numbers = #tpu.dot_dimension_numbers<[1], [0], [0], [1], [0, 0, 1, 1], [], []>} : vector<8x32xf32>, vector<32x128xf32>, vector<8x128xf32> -> vector<8x128xf32>
    %156 = arith.addf %154, %155 : vector<8x128xf32>
    %157 = vector.extract_strided_slice %156 {offsets = [0, 0], sizes = [8, 32], strides = [1, 1]} : vector<8x128xf32> to vector<8x32xf32>
    %158 = arith.negf %157 : vector<8x32xf32>
    %159 = math.exp %158 : vector<8x32xf32>
    %cst_36 = arith.constant 1.000000e+00 : f32
    %160 = vector.broadcast %cst_36 : f32 to vector<8x32xf32>
    %161 = arith.addf %160, %159 : vector<8x32xf32>
    %162 = arith.divf %160, %161 : vector<8x32xf32>
    %163 = vector.extract_strided_slice %156 {offsets = [0, 32], sizes = [8, 32], strides = [1, 1]} : vector<8x128xf32> to vector<8x32xf32>
    %164 = arith.negf %163 : vector<8x32xf32>
    %165 = math.exp %164 : vector<8x32xf32>
    %cst_37 = arith.constant 1.000000e+00 : f32
    %166 = vector.broadcast %cst_37 : f32 to vector<8x32xf32>
    %167 = arith.addf %166, %165 : vector<8x32xf32>
    %168 = arith.divf %166, %167 : vector<8x32xf32>
    %169 = vector.extract_strided_slice %156 {offsets = [0, 64], sizes = [8, 32], strides = [1, 1]} : vector<8x128xf32> to vector<8x32xf32>
    %170 = math.tanh %169 : vector<8x32xf32>
    %171 = vector.extract_strided_slice %156 {offsets = [0, 96], sizes = [8, 32], strides = [1, 1]} : vector<8x128xf32> to vector<8x32xf32>
    %172 = arith.negf %171 : vector<8x32xf32>
    %173 = math.exp %172 : vector<8x32xf32>
    %cst_38 = arith.constant 1.000000e+00 : f32
    %174 = vector.broadcast %cst_38 : f32 to vector<8x32xf32>
    %175 = arith.addf %174, %173 : vector<8x32xf32>
    %176 = arith.divf %174, %175 : vector<8x32xf32>
    %177 = arith.mulf %168, %150 : vector<8x32xf32>
    %178 = arith.mulf %162, %170 : vector<8x32xf32>
    %179 = arith.addf %177, %178 : vector<8x32xf32>
    %180 = math.tanh %179 : vector<8x32xf32>
    %181 = arith.mulf %176, %180 : vector<8x32xf32>
    %c40 = arith.constant 40 : index
    %c0_39 = arith.constant 0 : index
    %182 = vector.load %arg7[%c40, %c0_39] : memref<64x32xf32, #tpu.memory_space<vmem>>, vector<8x32xf32>
    tpu.vector_store %arg7[%c40, %c0_39], %181 {strides = array<i32>} : memref<64x32xf32, #tpu.memory_space<vmem>>, vector<8x32xf32>,
    %183 = vector.extract_strided_slice %5 {offsets = [48, 0], sizes = [8, 128], strides = [1, 1]} : vector<64x128xf32> to vector<8x128xf32>
    %cst_40 = arith.constant dense<0.000000e+00> : vector<8x128xf32>
    %184 = tpu.matmul %181, %6, %cst_40 {dimension_numbers = #tpu.dot_dimension_numbers<[1], [0], [0], [1], [0, 0, 1, 1], [], []>} : vector<8x32xf32>, vector<32x128xf32>, vector<8x128xf32> -> vector<8x128xf32>
    %185 = arith.addf %183, %184 : vector<8x128xf32>
    %186 = vector.extract_strided_slice %185 {offsets = [0, 0], sizes = [8, 32], strides = [1, 1]} : vector<8x128xf32> to vector<8x32xf32>
    %187 = arith.negf %186 : vector<8x32xf32>
    %188 = math.exp %187 : vector<8x32xf32>
    %cst_41 = arith.constant 1.000000e+00 : f32
    %189 = vector.broadcast %cst_41 : f32 to vector<8x32xf32>
    %190 = arith.addf %189, %188 : vector<8x32xf32>
    %191 = arith.divf %189, %190 : vector<8x32xf32>
    %192 = vector.extract_strided_slice %185 {offsets = [0, 32], sizes = [8, 32], strides = [1, 1]} : vector<8x128xf32> to vector<8x32xf32>
    %193 = arith.negf %192 : vector<8x32xf32>
    %194 = math.exp %193 : vector<8x32xf32>
    %cst_42 = arith.constant 1.000000e+00 : f32
    %195 = vector.broadcast %cst_42 : f32 to vector<8x32xf32>
    %196 = arith.addf %195, %194 : vector<8x32xf32>
    %197 = arith.divf %195, %196 : vector<8x32xf32>
    %198 = vector.extract_strided_slice %185 {offsets = [0, 64], sizes = [8, 32], strides = [1, 1]} : vector<8x128xf32> to vector<8x32xf32>
    %199 = math.tanh %198 : vector<8x32xf32>
    %200 = vector.extract_strided_slice %185 {offsets = [0, 96], sizes = [8, 32], strides = [1, 1]} : vector<8x128xf32> to vector<8x32xf32>
    %201 = arith.negf %200 : vector<8x32xf32>
    %202 = math.exp %201 : vector<8x32xf32>
    %cst_43 = arith.constant 1.000000e+00 : f32
    %203 = vector.broadcast %cst_43 : f32 to vector<8x32xf32>
    %204 = arith.addf %203, %202 : vector<8x32xf32>
    %205 = arith.divf %203, %204 : vector<8x32xf32>
    %206 = arith.mulf %197, %179 : vector<8x32xf32>
    %207 = arith.mulf %191, %199 : vector<8x32xf32>
    %208 = arith.addf %206, %207 : vector<8x32xf32>
    %209 = math.tanh %208 : vector<8x32xf32>
    %210 = arith.mulf %205, %209 : vector<8x32xf32>
    %c48 = arith.constant 48 : index
    %c0_44 = arith.constant 0 : index
    %211 = vector.load %arg7[%c48, %c0_44] : memref<64x32xf32, #tpu.memory_space<vmem>>, vector<8x32xf32>
    tpu.vector_store %arg7[%c48, %c0_44], %210 {strides = array<i32>} : memref<64x32xf32, #tpu.memory_space<vmem>>, vector<8x32xf32>,
    %212 = vector.extract_strided_slice %5 {offsets = [56, 0], sizes = [8, 128], strides = [1, 1]} : vector<64x128xf32> to vector<8x128xf32>
    %cst_45 = arith.constant dense<0.000000e+00> : vector<8x128xf32>
    %213 = tpu.matmul %210, %6, %cst_45 {dimension_numbers = #tpu.dot_dimension_numbers<[1], [0], [0], [1], [0, 0, 1, 1], [], []>} : vector<8x32xf32>, vector<32x128xf32>, vector<8x128xf32> -> vector<8x128xf32>
    %214 = arith.addf %212, %213 : vector<8x128xf32>
    %215 = vector.extract_strided_slice %214 {offsets = [0, 0], sizes = [8, 32], strides = [1, 1]} : vector<8x128xf32> to vector<8x32xf32>
    %216 = arith.negf %215 : vector<8x32xf32>
    %217 = math.exp %216 : vector<8x32xf32>
    %cst_46 = arith.constant 1.000000e+00 : f32
    %218 = vector.broadcast %cst_46 : f32 to vector<8x32xf32>
    %219 = arith.addf %218, %217 : vector<8x32xf32>
    %220 = arith.divf %218, %219 : vector<8x32xf32>
    %221 = vector.extract_strided_slice %214 {offsets = [0, 32], sizes = [8, 32], strides = [1, 1]} : vector<8x128xf32> to vector<8x32xf32>
    %222 = arith.negf %221 : vector<8x32xf32>
    %223 = math.exp %222 : vector<8x32xf32>
    %cst_47 = arith.constant 1.000000e+00 : f32
    %224 = vector.broadcast %cst_47 : f32 to vector<8x32xf32>
    %225 = arith.addf %224, %223 : vector<8x32xf32>
    %226 = arith.divf %224, %225 : vector<8x32xf32>
    %227 = vector.extract_strided_slice %214 {offsets = [0, 64], sizes = [8, 32], strides = [1, 1]} : vector<8x128xf32> to vector<8x32xf32>
    %228 = math.tanh %227 : vector<8x32xf32>
    %229 = vector.extract_strided_slice %214 {offsets = [0, 96], sizes = [8, 32], strides = [1, 1]} : vector<8x128xf32> to vector<8x32xf32>
    %230 = arith.negf %229 : vector<8x32xf32>
    %231 = math.exp %230 : vector<8x32xf32>
    %cst_48 = arith.constant 1.000000e+00 : f32
    %232 = vector.broadcast %cst_48 : f32 to vector<8x32xf32>
    %233 = arith.addf %232, %231 : vector<8x32xf32>
    %234 = arith.divf %232, %233 : vector<8x32xf32>
    %235 = arith.mulf %226, %208 : vector<8x32xf32>
    %236 = arith.mulf %220, %228 : vector<8x32xf32>
    %237 = arith.addf %235, %236 : vector<8x32xf32>
    %238 = math.tanh %237 : vector<8x32xf32>
    %239 = arith.mulf %234, %238 : vector<8x32xf32>
    %c56 = arith.constant 56 : index
    %c0_49 = arith.constant 0 : index
    %240 = vector.load %arg7[%c56, %c0_49] : memref<64x32xf32, #tpu.memory_space<vmem>>, vector<8x32xf32>
    tpu.vector_store %arg7[%c56, %c0_49], %239 {strides = array<i32>} : memref<64x32xf32, #tpu.memory_space<vmem>>, vector<8x32xf32>,
    %c0_50 = arith.constant 0 : index
    %c0_51 = arith.constant 0 : index
    %241 = vector.load %arg7[%c0_50, %c0_51] : memref<64x32xf32, #tpu.memory_space<vmem>>, vector<64x32xf32>
    %c0_52 = arith.constant 0 : index
    %c0_53 = arith.constant 0 : index
    %242 = vector.load %arg4[%c0_52, %c0_53] : memref<32x128xf32, #tpu.memory_space<vmem>>, vector<32x128xf32>
    %cst_54 = arith.constant dense<0.000000e+00> : vector<64x128xf32>
    %243 = tpu.matmul %241, %242, %cst_54 {dimension_numbers = #tpu.dot_dimension_numbers<[1], [0], [0], [1], [0, 0, 1, 1], [], []>} : vector<64x32xf32>, vector<32x128xf32>, vector<64x128xf32> -> vector<64x128xf32>
    %c0_55 = arith.constant 0 : index
    %c0_56 = arith.constant 0 : index
    %244 = vector.load %arg5[%c0_55, %c0_56] : memref<1x128xf32, #tpu.memory_space<vmem>>, vector<1x128xf32>
    %245 = vector.broadcast %244 : vector<1x128xf32> to vector<64x128xf32>
    %246 = arith.addf %243, %245 : vector<64x128xf32>
    %c0_57 = arith.constant 0 : index
    %c0_58 = arith.constant 0 : index
    %247 = vector.load %arg6[%c0_57, %c0_58] : memref<64x128xf32, #tpu.memory_space<vmem>>, vector<64x128xf32>
    tpu.vector_store %arg6[%c0_57, %c0_58], %246 {strides = array<i32>} : memref<64x128xf32, #tpu.memory_space<vmem>>, vector<64x128xf32>,
    return
  }
}

</mosaic_0001>

<bundles_post_ra>
// kernel: decoder_rnn_forward.1
= control target key start
LH: loop header
LB: loop body
LE: loop exit
PB: predicated region body
PF: predicated region fallthrough
CT: control target
= control target key end

     0   :  { %vm42_vm0 = vcmask 261120   ;;  %v1515_v13 = vmov 0.0|0.0   ;;  %vm1516_vm1 = vmmov 0   ;;  %v1517_v19 = vmov 0.0   ;;  %s1518_s25 = smov 64   ;;  %s1797_s1 = inlined_call_operand.vmem [shape: f32[32,128], index: 1, kind: input, shape index: {}]   ;;  %s1798_s0 = inlined_call_operand.vmem [shape: f32[64,32], index: 0, kind: input, shape index: {}]   ;;  %s1799_s2 = inlined_call_operand.vmem [shape: f32[32,128], index: 2, kind: input, shape index: {}]   ;;  %s1800_s3 = inlined_call_operand.vmem [shape: f32[1,128], index: 3, kind: input, shape index: {}]   ;;  %s1801_s4 = inlined_call_operand.vmem [shape: f32[32,128], index: 4, kind: input, shape index: {}]   ;;  %s1802_s5 = inlined_call_operand.vmem [shape: f32[1,128], index: 5, kind: input, shape index: {}]   ;;  %s1803_s6 = inlined_call_operand.vmem [shape: f32[64,128], index: 6, kind: output, shape index: {}]  }
   0x1   :  { %v31_v0 = vld [vmem:[%s1797_s1] sm:$0xff]  ;;  %v32_v1 = vld [vmem:[%s1797_s1 + $0x8] sm:$0xff]  ;;  %v33_v2 = vld [vmem:[%s1797_s1 + $0x10] sm:$0xff] }
   0x2   :  { %v1378_v3 = vpack.c.bf16 %v32_v1, %v31_v0  ;;  %v34_v4 = vld [vmem:[%s1797_s1 + $0x18] sm:$0xff]  ;;  %v27_v5 = vld [vmem:[%s1798_s0 + $0x20] sm:$0xff]  ;;  %v173_v9 = vld [vmem:[%s1799_s2 + $0x8] sm:$0xff] }
   0x3   :  { %v1382_v6 = vpack.c.bf16 %v34_v4, %v33_v2  ;;  %1264 = vmatprep.mubr.msk.f32.mxu1 %vm42_vm0, %v27_v5  ;;  %v23_v7 = vld [vmem:[%s1798_s0] sm:$0xff]  ;;  %v28_v10 = vld [vmem:[%s1798_s0 + $0x28] sm:$0xff]  ;;  %v29_v14 = vld [vmem:[%s1798_s0 + $0x30] sm:$0xff] }
   0x4   :  { %1442 = vmatprep.subr.bf16.mxu1 %v1378_v3  ;;  %1379 = vmatprep.subr.bf16.mxu0 %v1378_v3  ;;  %v172_v8 = vld [vmem:[%s1799_s2] sm:$0xff]  ;;  %v24_v12 = vld [vmem:[%s1798_s0 + $0x8] sm:$0xff]  ;;  %v174_v15 = vld [vmem:[%s1799_s2 + $0x10] sm:$0xff] }
   0x5   :  { %1444 = vmatpush3.bf16.msra.mxu1 %v1378_v3  ;;  %1381 = vmatpush3.bf16.msra.mxu0 %v1378_v3  ;;  %v1584_v11 = vpack.c.bf16 %v173_v9, %v172_v8  ;;  %v175_v16 = vld [vmem:[%s1799_s2 + $0x18] sm:$0xff]  ;;  %v1633_v24 = vld [vmem:[%s1800_s3] ss:$0 sm:$0xff]  ;;  %s1519_s3 = smov 32   ;;  %v25_v59 = vld [vmem:[%s1798_s0 + $0x10] sm:$0xff] }
   0x6   :  { %1443 = vmatprep.subr.bf16.mxu1 %v1382_v6  ;;  %1383 = vmatprep.subr.bf16.mxu0 %v1382_v6  ;;  %v30_v17 = vld [vmem:[%s1798_s0 + $0x38] sm:$0xff]  ;;  %v1607_v18 = vpack.c.bf16 %v175_v16, %v174_v15 }
   0x7   :  { %1258 = vmatprep.mubr.msk.f32.mxu0 %vm42_vm0, %v23_v7  ;;  %v26_v60 = vld [vmem:[%s1798_s0 + $0x18] sm:$0xff] }
   0x9   :  { %1445 = vmatpush3.bf16.msra.mxu1 %v1382_v6  ;;  %1385 = vmatpush3.bf16.msra.mxu0 %v1382_v6 }
   0xa   :  { %1386 = vmatprep.subr.bf16.mxu1 %v1515_v13  ;;  %1398 = vmatprep.subr.bf16.mxu0 %v1515_v13 }
   0xc   :  { %1265 = vmatmul.mubr.msk.f32.vlgmr.msra.gmra.mrb[0].mxu1 %vm42_vm0, %v28_v10  ;;  %1259 = vmatmul.mubr.msk.f32.vlgmr.msra.gmra.mrb[0].mxu0 %vm42_vm0, %v24_v12 }
   0xd   :  { %1388 = vmatpush3.bf16.msra.mxu1 %v1584_v11  ;;  %1267 = vmatprep.mubr.msk.f32.mxu1 %vm42_vm0, %v29_v14 }
   0xe   :  { %1389 = vmatprep.subr.bf16.mxu1 %v1515_v13  ;;  %1400 = vmatpush3.bf16.msra.mxu0 %v1584_v11 }
   0xf   :  { %1401 = vmatprep.subr.bf16.mxu0 %v1515_v13  ;;  %1261 = vmatprep.mubr.msk.f32.mxu0 %vm42_vm0, %v25_v59 }
  0x10   :  { %1268 = vmatmul.mubr.msk.f32.gmra.mrb[2].mxu1 %vm42_vm0, %v30_v17  ;;  %1262 = vmatmul.mubr.msk.f32.gmra.mrb[2].mxu0 %vm42_vm0, %v26_v60 }
  0x11   :  { %1391 = vmatpush3.bf16.msra.mxu1 %v1607_v18  ;;  %1278 = vmatprep.mubr.msk.f32.mxu1 %vm1516_vm1, %v1517_v19 }
  0x12   :  { %1392 = vmatprep.subr.bf16.mxu1 %v1515_v13  ;;  %1403 = vmatpush3.bf16.msra.mxu0 %v1607_v18 }
  0x13   :  { %1410 = vmatprep.subr.bf16.mxu0 %v1515_v13  ;;  %1300 = vmatprep.mubr.msk.f32.mxu0 %vm1516_vm1, %v1517_v19 }
  0x14   :  { %1279 = vmatmul.mubr.f32.vlgmr.msra.gmra.mrb[4].mxu1 %v1517_v19 }
  0x15   :  { %1394 = vmatpush3.bf16.msra.mxu1 %v1584_v11  ;;  %1289 = vmatprep.mubr.msk.f32.mxu1 %vm1516_vm1, %v1517_v19 }
  0x16   :  { %1395 = vmatprep.subr.bf16.mxu1 %v1515_v13 }
  0x19   :  { %1397 = vmatpush3.bf16.msra.mxu1 %v1607_v18 }
  0x1a   :  { %1404 = vmatprep.subr.bf16.mxu1 %v1515_v13 }
  0xdf   :  { %v1626_v20 = vpop.f32.mrb[0].mxu1  ;;  %v1260_v21 = vpop.f32.mrb[0].mxu0 }
  0xe0   :  { %v1628_v22 = vpop.f32.mrb[1].mxu1  ;;  %v133_v23 = vpop.f32.mrb[1].mxu0  ;;  %v139_v45 = vadd.f32 %v1260_v21, %v1633_v24 }
  0xe1   :  { %v134_v27 = vadd.f32 %v1633_v24, %v133_v23 }
  0xe3   :  { %v1635_v25 = vpop.f32.mrb[2].mxu1  ;;  %v1263_v0 = vpop.f32.mrb[2].mxu0 }
  0xe4   :  { %v1637_v26 = vpop.f32.mrb[3].mxu1  ;;  %v143_v1 = vpop.f32.mrb[3].mxu0 }
  0xe5   :  { %v144_v3 = vadd.f32 %v1633_v24, %v143_v1  ;;  %v159_v1 = vadd.f32 %v1626_v20, %v1633_v24 }
  0xe7   :  { %v245_v28 = vpop.f32.mrb[4].mxu1 }
  0xe8   :  { %v249_v29 = vadd.f32 %v245_v28, %v134_v27  ;;  %v1280_v30 = vpop.f32.mrb[5].mxu1 }
  0xe9   :  { %v149_v30 = vadd.f32 %v1263_v0, %v1633_v24 }
  0xea   :  { %1451 = vtanh.f32 %v249_v29  ;;  %v1162_v32 = vmul.f32 -1.442695, %v249_v29 }
  0xec   :  { %1453 = vpow2.f32 %v1162_v32 }
  0xf4   :  { %v1452_v31 = vpop.eup %1451 }
  0xf5   :  { %259 = vrot.lane.b32.xlu0 %v1452_v31, %s1518_s25 }
  0xf6   :  { %v1454_v33 = vpop.eup %1453 }
  0xf7   :  { %v253_v34 = vadd.f32 1.0, %v1454_v33 }
  0xf9   :  { %1455 = vrcp.f32 %v253_v34 }
 0x103   :  { %v1456_v35 = vpop.eup %1455 }
 0x104   :  { %v257_v38 = vmul.f32 0.0, %v1456_v35 }
 0x167   :  { %v260_v36 = vpop.permute.xlu0 %259 }
 0x168   :  { %v262_v37 = vmul.f32 %v1456_v35, %v260_v36 }
 0x16a   :  { %264 = vrot.lane.b32.xlu0 %v262_v37, %s1519_s3 }
 0x1dc   :  { %v265_v39 = vpop.permute.xlu0 %264 }
 0x1dd   :  { %v267_v40 = vadd.f32 %v265_v39, %v257_v38 }
 0x1df   :  { %1457 = vtanh.f32 %v267_v40 }
 0x1e9   :  { %v1458_v41 = vpop.eup %1457 }
 0x1ea   :  { %270 = vrot.lane.b32.xlu1 %v1458_v41, %s1518_s25 }
 0x25c   :  { %v271_v42 = vpop.permute.xlu1 %270 }
 0x25d   :  { %v273_v43 = vmul.f32 %v1456_v35, %v271_v42 }
 0x25f   :  { %275 = vrot.lane.b32.xlu1 %v273_v43, %s1519_s3 }
 0x2d1   :  { %v276_v44 = vpop.permute.xlu1 %275 }
 0x2d2   :  { %278 = vst.msk [vmem:[#allocation2] sm:$0xff] %vm42_vm0, %v276_v44  ;;  %1290 = vmatmul.mubr.msk.f32.vlgmr.msra.gmra.mrb[6].mxu1 %vm42_vm0, %v276_v44 }
 0x2d3   :  { %1406 = vmatpush3.bf16.msra.mxu1 %v1584_v11  ;;  %1311 = vmatprep.mubr.msk.f32.mxu1 %vm1516_vm1, %v1517_v19 }
 0x2d4   :  { %1407 = vmatprep.subr.bf16.mxu1 %v1515_v13 }
 0x2d7   :  { %1409 = vmatpush3.bf16.msra.mxu1 %v1607_v18 }
 0x2d8   :  { %1416 = vmatprep.subr.bf16.mxu1 %v1515_v13 }
 0x3a5   :  { %v347_v46 = vpop.f32.mrb[6].mxu1 }
 0x3a6   :  { %v351_v47 = vadd.f32 %v347_v46, %v139_v45  ;;  %v1291_v48 = vpop.f32.mrb[7].mxu1 }
 0x3a7   :  { %v154_v48 = vadd.f32 %v1633_v24, %v1628_v22 }
 0x3a8   :  { %1459 = vtanh.f32 %v351_v47  ;;  %v1164_v50 = vmul.f32 -1.442695, %v351_v47 }
 0x3aa   :  { %1461 = vpow2.f32 %v1164_v50 }
 0x3b2   :  { %v1460_v49 = vpop.eup %1459 }
 0x3b3   :  { %361 = vrot.lane.b32.xlu0 %v1460_v49, %s1518_s25 }
 0x3b4   :  { %v1462_v51 = vpop.eup %1461 }
 0x3b5   :  { %v355_v52 = vadd.f32 1.0, %v1462_v51 }
 0x3b7   :  { %1463 = vrcp.f32 %v355_v52 }
 0x3c1   :  { %v1464_v53 = vpop.eup %1463 }
 0x3c2   :  { %v359_v56 = vmul.f32 %v1464_v53, %v267_v40 }
 0x425   :  { %v362_v54 = vpop.permute.xlu0 %361 }
 0x426   :  { %v364_v55 = vmul.f32 %v1464_v53, %v362_v54 }
 0x428   :  { %366 = vrot.lane.b32.xlu1 %v364_v55, %s1519_s3 }
 0x49a   :  { %v367_v57 = vpop.permute.xlu1 %366 }
 0x49b   :  { %v369_v58 = vadd.f32 %v367_v57, %v359_v56 }
 0x49d   :  { %1465 = vtanh.f32 %v369_v58 }
 0x4a7   :  { %v1466_v61 = vpop.eup %1465 }
 0x4a8   :  { %372 = vrot.lane.b32.xlu0 %v1466_v61, %s1518_s25 }
 0x51a   :  { %v373_v62 = vpop.permute.xlu0 %372 }
 0x51b   :  { %v375_v63 = vmul.f32 %v1464_v53, %v373_v62 }
 0x51d   :  { %377 = vrot.lane.b32.xlu1 %v375_v63, %s1519_s3 }
 0x58f   :  { %v378_v2 = vpop.permute.xlu1 %377 }
 0x590   :  { %380 = vst.msk [vmem:[#allocation2 + $0x8] sm:$0xff] %vm42_vm0, %v378_v2  ;;  %1301 = vmatmul.mubr.msk.f32.vlgmr.msra.gmra.mrb[4].mxu0 %vm42_vm0, %v378_v2 }
 0x591   :  { %1412 = vmatpush3.bf16.msra.mxu0 %v1584_v11  ;;  %1322 = vmatprep.mubr.msk.f32.mxu0 %vm1516_vm1, %v1517_v19 }
 0x592   :  { %1413 = vmatprep.subr.bf16.mxu0 %v1515_v13 }
 0x595   :  { %1415 = vmatpush3.bf16.msra.mxu0 %v1607_v18 }
 0x596   :  { %1422 = vmatprep.subr.bf16.mxu0 %v1515_v13 }
 0x663   :  { %v449_v4 = vpop.f32.mrb[4].mxu0 }
 0x664   :  { %v453_v5 = vadd.f32 %v449_v4, %v144_v3  ;;  %v1302_v6 = vpop.f32.mrb[5].mxu0 }
 0x666   :  { %1467 = vtanh.f32 %v453_v5  ;;  %v1166_v8 = vmul.f32 -1.442695, %v453_v5 }
 0x668   :  { %1469 = vpow2.f32 %v1166_v8 }
 0x670   :  { %v1468_v7 = vpop.eup %1467 }
 0x671   :  { %463 = vrot.lane.b32.xlu0 %v1468_v7, %s1518_s25 }
 0x672   :  { %v1470_v9 = vpop.eup %1469 }
 0x673   :  { %v457_v10 = vadd.f32 1.0, %v1470_v9 }
 0x675   :  { %1471 = vrcp.f32 %v457_v10  ;;  %v1001_v10 = vld [vmem:[%s1801_s4] sm:$0xff] }
 0x67f   :  { %v1472_v12 = vpop.eup %1471 }
 0x680   :  { %v461_v16 = vmul.f32 %v1472_v12, %v369_v58 }
 0x6e3   :  { %v464_v14 = vpop.permute.xlu0 %463 }
 0x6e4   :  { %v466_v15 = vmul.f32 %v1472_v12, %v464_v14 }
 0x6e6   :  { %468 = vrot.lane.b32.xlu1 %v466_v15, %s1519_s3 }
 0x758   :  { %v469_v17 = vpop.permute.xlu1 %468 }
 0x759   :  { %v471_v21 = vadd.f32 %v469_v17, %v461_v16 }
 0x75b   :  { %1473 = vtanh.f32 %v471_v21 }
 0x765   :  { %v1474_v23 = vpop.eup %1473 }
 0x766   :  { %474 = vrot.lane.b32.xlu0 %v1474_v23, %s1518_s25  ;;  %v1004_v23 = vld [vmem:[%s1801_s4 + $0x18] sm:$0xff] }
 0x7d8   :  { %v475_v27 = vpop.permute.xlu0 %474 }
 0x7d9   :  { %v477_v28 = vmul.f32 %v1472_v12, %v475_v27  ;;  %v1002_v12 = vld [vmem:[%s1801_s4 + $0x8] sm:$0xff] }
 0x7da   :  { %v1434_v14 = vpack.c.bf16 %v1002_v12, %v1001_v10 }
 0x7db   :  { %479 = vrot.lane.b32.xlu1 %v477_v28, %s1519_s3 }
 0x84d   :  { %v480_v29 = vpop.permute.xlu1 %479 }
 0x84e   :  { %482 = vst.msk [vmem:[#allocation2 + $0x10] sm:$0xff] %vm42_vm0, %v480_v29  ;;  %1312 = vmatmul.mubr.msk.f32.vlgmr.msra.gmra.mrb[8].mxu1 %vm42_vm0, %v480_v29  ;;  %v993_v29 = vld [vmem:[#allocation2] sm:$0xff] }
 0x84f   :  { %1418 = vmatpush3.bf16.msra.mxu1 %v1584_v11  ;;  %1333 = vmatprep.mubr.msk.f32.mxu1 %vm1516_vm1, %v1517_v19 }
 0x850   :  { %1419 = vmatprep.subr.bf16.mxu1 %v1515_v13 }
 0x853   :  { %1421 = vmatpush3.bf16.msra.mxu1 %v1607_v18 }
 0x854   :  { %1428 = vmatprep.subr.bf16.mxu1 %v1515_v13 }
 0x921   :  { %v551_v31 = vpop.f32.mrb[8].mxu1 }
 0x922   :  { %v555_v32 = vadd.f32 %v551_v31, %v149_v30  ;;  %v1313_v33 = vpop.f32.mrb[9].mxu1  ;;  %v994_v30 = vld [vmem:[#allocation2 + $0x8] sm:$0xff]  ;;  %v995_v31 = vld [vmem:[#allocation2 + $0x10] sm:$0xff] }
 0x924   :  { %1475 = vtanh.f32 %v555_v32  ;;  %v1168_v35 = vmul.f32 -1.442695, %v555_v32 }
 0x926   :  { %1477 = vpow2.f32 %v1168_v35  ;;  %v164_v35 = vadd.f32 %v1633_v24, %v1637_v26 }
 0x92e   :  { %v1476_v34 = vpop.eup %1475 }
 0x92f   :  { %565 = vrot.lane.b32.xlu0 %v1476_v34, %s1518_s25 }
 0x930   :  { %v1478_v36 = vpop.eup %1477 }
 0x931   :  { %v559_v37 = vadd.f32 1.0, %v1478_v36 }
 0x933   :  { %1479 = vrcp.f32 %v559_v37 }
 0x93d   :  { %v1480_v38 = vpop.eup %1479 }
 0x93e   :  { %v563_v41 = vmul.f32 %v1480_v38, %v471_v21  ;;  %v1003_v21 = vld [vmem:[%s1801_s4 + $0x10] sm:$0xff] }
 0x93f   :  { %v1438_v27 = vpack.c.bf16 %v1004_v23, %v1003_v21 }
 0x9a1   :  { %v566_v39 = vpop.permute.xlu0 %565 }
 0x9a2   :  { %v568_v40 = vmul.f32 %v1480_v38, %v566_v39  ;;  %v1747_v39 = vld [vmem:[%s1802_s5] ss:$0 sm:$0xff] }
 0x9a4   :  { %570 = vrot.lane.b32.xlu1 %v568_v40, %s1519_s3 }
 0xa16   :  { %v571_v42 = vpop.permute.xlu1 %570 }
 0xa17   :  { %v573_v43 = vadd.f32 %v571_v42, %v563_v41 }
 0xa19   :  { %1481 = vtanh.f32 %v573_v43 }
 0xa23   :  { %v1482_v44 = vpop.eup %1481 }
 0xa24   :  { %576 = vrot.lane.b32.xlu0 %v1482_v44, %s1518_s25 }
 0xa96   :  { %v577_v45 = vpop.permute.xlu0 %576 }
 0xa97   :  { %v579_v46 = vmul.f32 %v1480_v38, %v577_v45 }
 0xa99   :  { %581 = vrot.lane.b32.xlu1 %v579_v46, %s1519_s3 }
 0xb0b   :  { %v582_v47 = vpop.permute.xlu1 %581 }
 0xb0c   :  { %584 = vst.msk [vmem:[#allocation2 + $0x18] sm:$0xff] %vm42_vm0, %v582_v47  ;;  %1323 = vmatmul.mubr.msk.f32.vlgmr.msra.gmra.mrb[6].mxu0 %vm42_vm0, %v582_v47 }
 0xb0d   :  { %1424 = vmatpush3.bf16.msra.mxu0 %v1584_v11  ;;  %1344 = vmatprep.mubr.msk.f32.mxu0 %vm1516_vm1, %v1517_v19 }
 0xb0e   :  { %1425 = vmatprep.subr.bf16.mxu0 %v1515_v13 }
 0xb11   :  { %1427 = vmatpush3.bf16.msra.mxu0 %v1607_v18 }
 0xb12   :  { %1435 = vmatprep.subr.bf16.mxu0 %v1434_v14 }
 0xb13   :  { %v996_v32 = vld [vmem:[#allocation2 + $0x18] sm:$0xff] }
 0xbdf   :  { %v653_v49 = vpop.f32.mrb[6].mxu0 }
 0xbe0   :  { %v657_v50 = vadd.f32 %v653_v49, %v154_v48  ;;  %v1324_v51 = vpop.f32.mrb[7].mxu0 }
 0xbe2   :  { %1483 = vtanh.f32 %v657_v50  ;;  %v1170_v53 = vmul.f32 -1.442695, %v657_v50 }
 0xbe4   :  { %1485 = vpow2.f32 %v1170_v53 }
 0xbec   :  { %v1484_v52 = vpop.eup %1483 }
 0xbed   :  { %667 = vrot.lane.b32.xlu0 %v1484_v52, %s1518_s25 }
 0xbee   :  { %v1486_v54 = vpop.eup %1485 }
 0xbef   :  { %v661_v55 = vadd.f32 1.0, %v1486_v54 }
 0xbf1   :  { %1487 = vrcp.f32 %v661_v55 }
 0xbfb   :  { %v1488_v56 = vpop.eup %1487 }
 0xbfc   :  { %v665_v59 = vmul.f32 %v1488_v56, %v573_v43 }
 0xc5f   :  { %v668_v57 = vpop.permute.xlu0 %667 }
 0xc60   :  { %v670_v58 = vmul.f32 %v1488_v56, %v668_v57 }
 0xc62   :  { %672 = vrot.lane.b32.xlu1 %v670_v58, %s1519_s3 }
 0xcd4   :  { %v673_v60 = vpop.permute.xlu1 %672 }
 0xcd5   :  { %v675_v22 = vadd.f32 %v673_v60, %v665_v59 }
 0xcd7   :  { %1489 = vtanh.f32 %v675_v22 }
 0xce1   :  { %v1490_v61 = vpop.eup %1489 }
 0xce2   :  { %678 = vrot.lane.b32.xlu0 %v1490_v61, %s1518_s25 }
 0xd54   :  { %v679_v62 = vpop.permute.xlu0 %678 }
 0xd55   :  { %v681_v63 = vmul.f32 %v1488_v56, %v679_v62 }
 0xd57   :  { %683 = vrot.lane.b32.xlu1 %v681_v63, %s1519_s3 }
 0xdc9   :  { %v684_v0 = vpop.permute.xlu1 %683 }
 0xdca   :  { %686 = vst.msk [vmem:[#allocation2 + $0x20] sm:$0xff] %vm42_vm0, %v684_v0  ;;  %1334 = vmatmul.mubr.msk.f32.vlgmr.msra.gmra.mrb[10].mxu1 %vm42_vm0, %v684_v0 }
 0xdcb   :  { %1430 = vmatpush3.bf16.msra.mxu1 %v1584_v11  ;;  %1355 = vmatprep.mubr.msk.f32.mxu1 %vm1516_vm1, %v1517_v19 }
 0xdcc   :  { %1431 = vmatprep.subr.bf16.mxu1 %v1515_v13 }
 0xdcf   :  { %1433 = vmatpush3.bf16.msra.mxu1 %v1607_v18 }
 0xdd1   :  { %v997_v33 = vld [vmem:[#allocation2 + $0x20] sm:$0xff] }
 0xe9d   :  { %v755_v2 = vpop.f32.mrb[10].mxu1 }
 0xe9e   :  { %v759_v3 = vadd.f32 %v755_v2, %v159_v1  ;;  %v1335_v4 = vpop.f32.mrb[11].mxu1  ;;  %v169_v1 = vadd.f32 %v1635_v25, %v1633_v24 }
 0xea0   :  { %1491 = vtanh.f32 %v759_v3  ;;  %v1172_v6 = vmul.f32 -1.442695, %v759_v3 }
 0xea2   :  { %1493 = vpow2.f32 %v1172_v6 }
 0xeaa   :  { %v1492_v5 = vpop.eup %1491 }
 0xeab   :  { %769 = vrot.lane.b32.xlu0 %v1492_v5, %s1518_s25 }
 0xeac   :  { %v1494_v11 = vpop.eup %1493 }
 0xead   :  { %v763_v7 = vadd.f32 1.0, %v1494_v11 }
 0xeaf   :  { %1495 = vrcp.f32 %v763_v7 }
 0xeb9   :  { %v1496_v19 = vpop.eup %1495 }
 0xeba   :  { %v767_v18 = vmul.f32 %v1496_v19, %v675_v22 }
 0xf1d   :  { %v770_v8 = vpop.permute.xlu0 %769 }
 0xf1e   :  { %v772_v13 = vmul.f32 %v1496_v19, %v770_v8 }
 0xf20   :  { %774 = vrot.lane.b32.xlu1 %v772_v13, %s1519_s3 }
 0xf92   :  { %v775_v9 = vpop.permute.xlu1 %774 }
 0xf93   :  { %v1717_v20 = vadd.f32 %v775_v9, %v767_v18 }
 0xf95   :  { %1497 = vtanh.f32 %v1717_v20 }
 0xf9f   :  { %v1498_v15 = vpop.eup %1497 }
 0xfa0   :  { %780 = vrot.lane.b32.xlu0 %v1498_v15, %s1518_s25 }
0x1012   :  { %v781_v16 = vpop.permute.xlu0 %780 }
0x1013   :  { %v783_v17 = vmul.f32 %v1496_v19, %v781_v16 }
0x1015   :  { %785 = vrot.lane.b32.xlu1 %v783_v17, %s1519_s3 }
0x1087   :  { %v786_v28 = vpop.permute.xlu1 %785 }
0x1088   :  { %788 = vst.msk [vmem:[#allocation2 + $0x28] sm:$0xff] %vm42_vm0, %v786_v28  ;;  %1345 = vmatmul.mubr.msk.f32.vlgmr.msra.gmra.mrb[8].mxu0 %vm42_vm0, %v786_v28 }
0x1089   :  { %1437 = vmatpush3.bf16.msra.mxu0 %v1434_v14  ;;  %1366 = vmatprep.mubr.msk.f32.mxu0 %vm42_vm0, %v993_v29 }
0x108a   :  { %1439 = vmatprep.subr.bf16.mxu0 %v1438_v27 }
0x108d   :  { %1441 = vmatpush3.bf16.msra.mxu0 %v1438_v27 }
0x108f   :  { %v998_v34 = vld [vmem:[#allocation2 + $0x28] sm:$0xff] }
0x1090   :  { %1367 = vmatmul.mubr.msk.f32.vlgmr.msra.gmra.mrb[10].mxu0 %vm42_vm0, %v994_v30 }
0x1091   :  { %1369 = vmatprep.mubr.msk.f32.mxu0 %vm42_vm0, %v995_v31 }
0x1094   :  { %1370 = vmatmul.mubr.msk.f32.gmra.mrb[12].mxu0 %vm42_vm0, %v996_v32 }
0x1095   :  { %1372 = vmatprep.mubr.msk.f32.mxu0 %vm42_vm0, %v997_v33 }
0x1098   :  { %1373 = vmatmul.mubr.msk.f32.gmra.mrb[14].mxu0 %vm42_vm0, %v998_v34 }
0x115b   :  { %v857_v36 = vpop.f32.mrb[8].mxu0 }
0x115c   :  { %v861_v37 = vadd.f32 %v857_v36, %v164_v35  ;;  %v1346_v38 = vpop.f32.mrb[9].mxu0 }
0x115e   :  { %1499 = vtanh.f32 %v861_v37  ;;  %v1174_v52 = vmul.f32 -1.442695, %v861_v37 }
0x1160   :  { %1501 = vpow2.f32 %v1174_v52 }
0x1163   :  { %v1368_v40 = vpop.f32.mrb[10].mxu0 }
0x1164   :  { %v1108_v41 = vadd.f32 %v1368_v40, %v1747_v39  ;;  %v1102_v42 = vpop.f32.mrb[11].mxu0 }
0x1165   :  { %v1103_v43 = vadd.f32 %v1747_v39, %v1102_v42 }
0x1166   :  { %1142 = vst [vmem:[%s1803_s6 + $0x8] sm:$0xff] %v1108_v41 }
0x1167   :  { %1141 = vst [vmem:[%s1803_s6] sm:$0xff] %v1103_v43  ;;  %v1371_v26 = vpop.f32.mrb[12].mxu0 }
0x1168   :  { %v1500_v44 = vpop.eup %1499  ;;  %v1118_v45 = vadd.f32 %v1371_v26, %v1747_v39  ;;  %v1112_v46 = vpop.f32.mrb[13].mxu0 }
0x1169   :  { %v1113_v47 = vadd.f32 %v1747_v39, %v1112_v46  ;;  %871 = vrot.lane.b32.xlu0 %v1500_v44, %s1518_s25 }
0x116a   :  { %1144 = vst [vmem:[%s1803_s6 + $0x18] sm:$0xff] %v1118_v45  ;;  %v1502_v53 = vpop.eup %1501 }
0x116b   :  { %1143 = vst [vmem:[%s1803_s6 + $0x10] sm:$0xff] %v1113_v47  ;;  %v1374_v48 = vpop.f32.mrb[14].mxu0  ;;  %v865_v54 = vadd.f32 1.0, %v1502_v53 }
0x116c   :  { %v1128_v49 = vadd.f32 %v1374_v48, %v1747_v39  ;;  %v1122_v50 = vpop.f32.mrb[15].mxu0 }
0x116d   :  { %v1123_v51 = vadd.f32 %v1747_v39, %v1122_v50  ;;  %1503 = vrcp.f32 %v865_v54 }
0x116e   :  { %1146 = vst [vmem:[%s1803_s6 + $0x28] sm:$0xff] %v1128_v49 }
0x116f   :  { %1145 = vst [vmem:[%s1803_s6 + $0x20] sm:$0xff] %v1123_v51 }
0x1177   :  { %v1504_v55 = vpop.eup %1503 }
0x1178   :  { %v869_v58 = vmul.f32 %v1504_v55, %v1717_v20 }
0x11db   :  { %v872_v56 = vpop.permute.xlu0 %871 }
0x11dc   :  { %v874_v57 = vmul.f32 %v1504_v55, %v872_v56 }
0x11de   :  { %876 = vrot.lane.b32.xlu1 %v874_v57, %s1519_s3 }
0x1250   :  { %v877_v59 = vpop.permute.xlu1 %876 }
0x1251   :  { %v879_v60 = vadd.f32 %v877_v59, %v869_v58 }
0x1253   :  { %1505 = vtanh.f32 %v879_v60 }
0x125d   :  { %v1506_v22 = vpop.eup %1505 }
0x125e   :  { %882 = vrot.lane.b32.xlu0 %v1506_v22, %s1518_s25 }
0x12d0   :  { %v883_v61 = vpop.permute.xlu0 %882 }
0x12d1   :  { %v885_v62 = vmul.f32 %v1504_v55, %v883_v61 }
0x12d3   :  { %887 = vrot.lane.b32.xlu1 %v885_v62, %s1519_s3 }
0x1345   :  { %v888_v63 = vpop.permute.xlu1 %887 }
0x1346   :  { %890 = vst.msk [vmem:[#allocation2 + $0x30] sm:$0xff] %vm42_vm0, %v888_v63  ;;  %1356 = vmatmul.mubr.msk.f32.vlgmr.msra.gmra.mrb[12].mxu1 %vm42_vm0, %v888_v63 }
0x134d   :  { %v999_v0 = vld [vmem:[#allocation2 + $0x30] sm:$0xff] }
0x134e   :  { %1375 = vmatprep.mubr.msk.f32.mxu0 %vm42_vm0, %v999_v0 }
0x1419   :  { %v959_v2 = vpop.f32.mrb[12].mxu1 }
0x141a   :  { %v963_v3 = vadd.f32 %v959_v2, %v169_v1  ;;  %v1357_v4 = vpop.f32.mrb[13].mxu1 }
0x141c   :  { %1507 = vtanh.f32 %v963_v3  ;;  %v1176_v6 = vmul.f32 -1.442695, %v963_v3 }
0x141e   :  { %1509 = vpow2.f32 %v1176_v6 }
0x1426   :  { %v1508_v5 = vpop.eup %1507 }
0x1427   :  { %973 = vrot.lane.b32.xlu0 %v1508_v5, %s1518_s25 }
0x1428   :  { %v1510_v11 = vpop.eup %1509 }
0x1429   :  { %v967_v7 = vadd.f32 1.0, %v1510_v11 }
0x142b   :  { %1511 = vrcp.f32 %v967_v7 }
0x1435   :  { %v1512_v19 = vpop.eup %1511 }
0x1436   :  { %v971_v18 = vmul.f32 %v1512_v19, %v879_v60 }
0x1499   :  { %v974_v8 = vpop.permute.xlu0 %973 }
0x149a   :  { %v976_v13 = vmul.f32 %v1512_v19, %v974_v8 }
0x149c   :  { %978 = vrot.lane.b32.xlu1 %v976_v13, %s1519_s3 }
0x150e   :  { %v979_v9 = vpop.permute.xlu1 %978 }
0x150f   :  { %v981_v24 = vadd.f32 %v979_v9, %v971_v18 }
0x1511   :  { %1513 = vtanh.f32 %v981_v24 }
0x151b   :  { %v1514_v25 = vpop.eup %1513 }
0x151c   :  { %984 = vrot.lane.b32.xlu0 %v1514_v25, %s1518_s25 }
0x158e   :  { %v985_v20 = vpop.permute.xlu0 %984 }
0x158f   :  { %v987_v10 = vmul.f32 %v1512_v19, %v985_v20 }
0x1591   :  { %989 = vrot.lane.b32.xlu1 %v987_v10, %s1519_s3 }
0x1603   :  { %v990_v12 = vpop.permute.xlu1 %989 }
0x1604   :  { %992 = vst.msk [vmem:[#allocation2 + $0x38] sm:$0xff] %vm42_vm0, %v990_v12 }
0x160b   :  { %v1000_v14 = vld [vmem:[#allocation2 + $0x38] sm:$0xff] }
0x160c   :  { %1376 = vmatmul.mubr.msk.f32.gmra.mrb[16].mxu0 %vm42_vm0, %v1000_v14 }
0x16df   :  { %v1377_v15 = vpop.f32.mrb[16].mxu0 }
0x16e0   :  { %v1138_v16 = vadd.f32 %v1377_v15, %v1747_v39  ;;  %v1132_v17 = vpop.f32.mrb[17].mxu0 }
0x16e1   :  { %v1133_v21 = vadd.f32 %v1747_v39, %v1132_v17 }
0x16e2   :  { %1148 = vst [vmem:[%s1803_s6 + $0x38] sm:$0xff] %v1138_v16 }
0x16e3   :  { %1147 = vst [vmem:[%s1803_s6 + $0x30] sm:$0xff] %v1133_v21 }

</bundles_post_ra>
